<compile_context>
chip_gen: v6e
topology: v6e:2x2x1
jax: 0.10.0
libtpu: 0.0.40
codegen_flags: <defaults>
</compile_context>

<pallas_src>
import functools
import math

import jax
import jax.numpy as jnp
from jax.experimental import pallas as pl
from jax.experimental.pallas import tpu as pltpu


# ----------------------------- small helpers --------------------------------------


def _gelu(x):
    # TODO(synk): PyTorch/Whisper use the exact erf GELU; tanh approximation kept here
    #             for robust Mosaic lowering (runs on the EUP).
    c = math.sqrt(2.0 / math.pi)
    return 0.5 * x * (1.0 + jnp.tanh(c * (x + 0.044715 * x * x * x)))


def _pick_tile(dim, target, align):
    """Largest multiple of `align` that divides `dim` and is <= target, else full dim."""
    if dim <= target:
        return dim
    t = (target // align) * align
    while t >= align:
        if dim % t == 0:
            return t
        t -= align
    return dim  # fall back to full extent (block == array dim is always legal)


# ----------------------------- tiled matmul (+bias/gelu/residual epilogue) ---------


def _make_matmul_kernel(activation, has_residual):
    def kernel(x_ref, w_ref, b_ref, *rest):
        if has_residual:
            r_ref, o_ref, acc_ref = rest
        else:
            o_ref, acc_ref = rest
            r_ref = None

        @pl.when(pl.program_id(2) == 0)
        def _init():
            acc_ref[...] = jnp.zeros_like(acc_ref)

        # bf16 (or f32) MXU inputs, f32 accumulation.
        acc_ref[...] += jnp.dot(
            x_ref[...], w_ref[...], preferred_element_type=jnp.float32
        )

        @pl.when(pl.program_id(2) == pl.num_programs(2) - 1)
        def _finalize():
            y = acc_ref[...] + b_ref[...].astype(jnp.float32)
            if activation == "gelu":
                y = _gelu(y)
            if r_ref is not None:
                y = y + r_ref[...].astype(jnp.float32)
            o_ref[...] = y.astype(o_ref.dtype)

    return kernel


def linear(x, w, b, residual=None, activation=None, *,
           tm_max=256, tn_max=256, tk_max=512):
    """act(x @ w + b) [+ residual], tiled on a (M//tm, N//tn, K//tk) grid."""
    M, K = x.shape
    N = w.shape[1]
    tm = _pick_tile(M, tm_max, 8)
    tn = _pick_tile(N, tn_max, 128)
    tk = _pick_tile(K, tk_max, 128)
    grid = (M // tm, N // tn, K // tk)

    in_specs = [
        pl.BlockSpec((tm, tk), lambda i, j, k: (i, k)),
        pl.BlockSpec((tk, tn), lambda i, j, k: (k, j)),
        pl.BlockSpec((1, tn), lambda i, j, k: (0, j)),
    ]
    args = [x, w, b.reshape(1, N)]
    if residual is not None:
        in_specs.append(pl.BlockSpec((tm, tn), lambda i, j, k: (i, j)))
        args.append(residual)

    bytes_acc = (x.size * x.dtype.itemsize + w.size * w.dtype.itemsize
                 + b.size * b.dtype.itemsize + M * N * x.dtype.itemsize)
    if residual is not None:
        bytes_acc += residual.size * residual.dtype.itemsize

    kernel = _make_matmul_kernel(activation, residual is not None)
    return pl.pallas_call(
        kernel,
        grid=grid,
        out_shape=jax.ShapeDtypeStruct((M, N), x.dtype),
        in_specs=in_specs,
        out_specs=pl.BlockSpec((tm, tn), lambda i, j, k: (i, j)),
        scratch_shapes=[pltpu.VMEM((tm, tn), jnp.float32)],
        compiler_params=pltpu.CompilerParams(
            dimension_semantics=("parallel", "parallel", "arbitrary")),
        cost_estimate=pl.CostEstimate(
            flops=2 * M * N * K,
            transcendentals=(M * N if activation == "gelu" else 0),
            bytes_accessed=bytes_acc),
    )(*args)


# ----------------------------- row-tiled layernorm ---------------------------------


def _layernorm_kernel(x_ref, g_ref, b_ref, o_ref, *, eps):
    x = x_ref[...].astype(jnp.float32)            # stats in f32 (v5e has no bf16 VPU)
    mean = jnp.mean(x, axis=-1, keepdims=True)
    var = jnp.mean((x - mean) ** 2, axis=-1, keepdims=True)
    inv = jax.lax.rsqrt(var + eps)
    y = (x - mean) * inv * g_ref[...].astype(jnp.float32) + b_ref[...].astype(jnp.float32)
    o_ref[...] = y.astype(o_ref.dtype)


def layer_norm(x, g, b, eps=1e-5, *, tm_max=512):
    M, D = x.shape
    tm = _pick_tile(M, tm_max, 8)
    kernel = functools.partial(_layernorm_kernel, eps=eps)
    return pl.pallas_call(
        kernel,
        grid=(M // tm,),
        out_shape=jax.ShapeDtypeStruct((M, D), x.dtype),
        in_specs=[pl.BlockSpec((tm, D), lambda i: (i, 0)),
                  pl.BlockSpec((1, D), lambda i: (0, 0)),
                  pl.BlockSpec((1, D), lambda i: (0, 0))],
        out_specs=pl.BlockSpec((tm, D), lambda i: (i, 0)),
        compiler_params=pltpu.CompilerParams(dimension_semantics=("parallel",)),
    )(x, g.reshape(1, D), b.reshape(1, D))


# ----------------------------- flash-style attention -------------------------------


def _flash_attn_kernel(q_ref, k_ref, v_ref, o_ref, m_sc, l_sc, acc_sc, *, scale):
    kv = pl.program_id(2)

    @pl.when(kv == 0)
    def _init():
        m_sc[...] = jnp.full_like(m_sc, -jnp.inf)
        l_sc[...] = jnp.zeros_like(l_sc)
        acc_sc[...] = jnp.zeros_like(acc_sc)

    # (hb,tq,dh) x (hb,tk,dh) -> (hb,tq,tk): MXU consumes K directly, no explicit k.T.
    s = jnp.einsum("hqd,hkd->hqk", q_ref[...], k_ref[...],
                   preferred_element_type=jnp.float32) * scale
    m_prev = m_sc[...]
    m_new = jnp.maximum(m_prev, jnp.max(s, axis=-1, keepdims=True))
    alpha = jnp.exp(m_prev - m_new)
    p = jnp.exp(s - m_new)
    l_sc[...] = alpha * l_sc[...] + jnp.sum(p, axis=-1, keepdims=True)
    acc_sc[...] = alpha * acc_sc[...] + jnp.einsum(
        "hqk,hkd->hqd", p.astype(v_ref.dtype), v_ref[...],
        preferred_element_type=jnp.float32)
    m_sc[...] = m_new

    @pl.when(kv == pl.num_programs(2) - 1)
    def _finalize():
        inv = pl.reciprocal(l_sc[...], approx=True)   # EUP slot, ~free
        o_ref[...] = (acc_sc[...] * inv).astype(o_ref.dtype)


def attention(q, k, v, *, hb_max=8, tq_max=128, tkv_max=128):
    """q,k,v: (B*H, T, dh).  Flash-style online softmax; multiple heads per block."""
    BH, T, dh = q.shape
    scale = 1.0 / math.sqrt(dh)
    hb = _pick_tile(BH, hb_max, 1)
    tq = _pick_tile(T, tq_max, 8)
    tkv = _pick_tile(T, tkv_max, 8)
    grid = (BH // hb, T // tq, T // tkv)

    q_spec = pl.BlockSpec((hb, tq, dh), lambda h, i, j: (h, i, 0))
    kv_spec = pl.BlockSpec((hb, tkv, dh), lambda h, i, j: (h, j, 0))
    o_spec = pl.BlockSpec((hb, tq, dh), lambda h, i, j: (h, i, 0))

    kernel = functools.partial(_flash_attn_kernel, scale=scale)
    return pl.pallas_call(
        kernel,
        grid=grid,
        out_shape=jax.ShapeDtypeStruct((BH, T, dh), q.dtype),
        in_specs=[q_spec, kv_spec, kv_spec],
        out_specs=o_spec,
        scratch_shapes=[pltpu.VMEM((hb, tq, 1), jnp.float32),
                        pltpu.VMEM((hb, tq, 1), jnp.float32),
                        pltpu.VMEM((hb, tq, dh), jnp.float32)],
        compiler_params=pltpu.CompilerParams(
            dimension_semantics=("parallel", "parallel", "arbitrary")),
        cost_estimate=pl.CostEstimate(
            flops=4 * BH * T * T * dh,
            transcendentals=BH * T * T,
            bytes_accessed=4 * q.size * q.dtype.itemsize),
    )(q, k, v)


# ----------------------------- conv1d via im2col + tiled matmul --------------------


def conv1d(x, w, b, *, stride, padding, activation=None):
    """PyTorch-style Conv1d (NCW): im2col (glue) + fused tiled matmul kernel.

    x: (B, C_in, T), w: (C_out, C_in, K), b: (C_out,) -> (B, C_out, T_out)
    """
    B, C_in, T = x.shape
    C_out, _, K = w.shape
    x_pad = jnp.pad(x, ((0, 0), (0, 0), (padding, padding)))
    T_out = (T + 2 * padding - K) // stride + 1
    idx = jnp.arange(T_out) * stride
    patches = jnp.stack([x_pad[:, :, idx + k] for k in range(K)], axis=-1)  # (B,Cin,Tout,K)
    patches = jnp.transpose(patches, (0, 2, 1, 3)).reshape(B * T_out, C_in * K)
    w2 = w.reshape(C_out, C_in * K).T  # (C_in*K, C_out)

    # pad the contraction dim up to a lane-aligned multiple of 128 when it is large
    # (e.g. whisper conv1: n_mels*3 = 240 -> 256); zero pad is exact.
    ck = C_in * K
    if ck > 128 and ck % 128 != 0:
        pad = (-ck) % 128
        patches = jnp.pad(patches, ((0, 0), (0, pad)))
        w2 = jnp.pad(w2, ((0, pad), (0, 0)))

    y = linear(patches, w2, b, activation=activation)      # (B*T_out, C_out)
    return y.reshape(B, T_out, C_out).transpose(0, 2, 1)   # (B, C_out, T_out)


# ----------------------------- Whisper audio encoder -------------------------------


def sinusoids(length, channels, max_timescale=10000.0):
    assert channels % 2 == 0
    log_ts_inc = math.log(max_timescale) / (channels // 2 - 1)
    inv_ts = jnp.exp(-log_ts_inc * jnp.arange(channels // 2, dtype=jnp.float32))
    scaled_t = jnp.arange(length, dtype=jnp.float32)[:, None] * inv_ts[None, :]
    return jnp.concatenate([jnp.sin(scaled_t), jnp.cos(scaled_t)], axis=1)


def init_params(key, *, n_mels, n_state, n_head, n_layer, n_ctx, dtype=jnp.bfloat16):
    def nrm(k, shape):
        return (0.02 * jax.random.normal(k, shape, dtype=jnp.float32)).astype(dtype)

    def zeros(shape):
        return jnp.zeros(shape, dtype)

    def ones(shape):
        return jnp.ones(shape, dtype)

    keys = iter(jax.random.split(key, 8 + 12 * n_layer))
    p = {
        "n_head": n_head,
        "conv1_w": nrm(next(keys), (n_state, n_mels, 3)),
        "conv1_b": zeros((n_state,)),
        "conv2_w": nrm(next(keys), (n_state, n_state, 3)),
        "conv2_b": zeros((n_state,)),
        "pos_emb": sinusoids(n_ctx, n_state).astype(dtype),
        "ln_post_g": ones((n_state,)),
        "ln_post_b": zeros((n_state,)),
        "blocks": [],
    }
    for _ in range(n_layer):
        wq = nrm(next(keys), (n_state, n_state))
        wk = nrm(next(keys), (n_state, n_state))
        wv = nrm(next(keys), (n_state, n_state))
        bq = zeros((n_state,))
        bk = zeros((n_state,))  # whisper key projection has no bias
        bv = zeros((n_state,))
        blk = {
            "attn_ln_g": ones((n_state,)),
            "attn_ln_b": zeros((n_state,)),
            # fused QKV projection: one matmul instead of three
            "wqkv": jnp.concatenate([wq, wk, wv], axis=1),
            "bqkv": jnp.concatenate([bq, bk, bv], axis=0),
            "wo": nrm(next(keys), (n_state, n_state)),
            "bo": zeros((n_state,)),
            "mlp_ln_g": ones((n_state,)),
            "mlp_ln_b": zeros((n_state,)),
            "w1": nrm(next(keys), (n_state, 4 * n_state)),
            "b1": zeros((4 * n_state,)),
            "w2": nrm(next(keys), (4 * n_state, n_state)),
            "b2": zeros((n_state,)),
        }
        p["blocks"].append(blk)
    return p


def audio_encoder_forward(x, params):
    """x: (B, n_mels, n_frames)  ->  (B, n_ctx, n_state)."""
    B = x.shape[0]
    h = conv1d(x, params["conv1_w"], params["conv1_b"], stride=1, padding=1, activation="gelu")
    h = conv1d(h, params["conv2_w"], params["conv2_b"], stride=2, padding=1, activation="gelu")
    h = jnp.transpose(h, (0, 2, 1))  # (B, n_ctx, n_state)
    h = h + params["pos_emb"][None, :, :].astype(h.dtype)

    _, T, n_state = h.shape
    n_head = params["n_head"]
    dh = n_state // n_head

    def to_heads(t):  # (B*T, n_state) -> (B*H, T, dh)
        return t.reshape(B, T, n_head, dh).transpose(0, 2, 1, 3).reshape(B * n_head, T, dh)

    def from_heads(t):  # (B*H, T, dh) -> (B*T, n_state)
        return t.reshape(B, n_head, T, dh).transpose(0, 2, 1, 3).reshape(B * T, n_state)

    h_flat = h.reshape(B * T, n_state)
    for blk in params["blocks"]:
        # --- residual self-attention (fused QKV, residual fused into out-proj) ---
        ln = layer_norm(h_flat, blk["attn_ln_g"], blk["attn_ln_b"])
        qkv = linear(ln, blk["wqkv"], blk["bqkv"])
        q = qkv[:, :n_state]
        k = qkv[:, n_state:2 * n_state]
        v = qkv[:, 2 * n_state:]
        o = attention(to_heads(q), to_heads(k), to_heads(v))
        h_flat = linear(from_heads(o), blk["wo"], blk["bo"], residual=h_flat)

        # --- residual MLP (residual fused into second matmul epilogue) ---
        ln = layer_norm(h_flat, blk["mlp_ln_g"], blk["mlp_ln_b"])
        m = linear(ln, blk["w1"], blk["b1"], activation="gelu")
        h_flat = linear(m, blk["w2"], blk["b2"], residual=h_flat)

    h_flat = layer_norm(h_flat, params["ln_post_g"], params["ln_post_b"])
    return h_flat.reshape(B, T, n_state)


# ----------------------------- driver -----------------------------------------------

if __name__ == "__main__":
    # Small, whisper-consistent shapes:
    #   batch=2, n_mels=8, n_frames=16  --conv(stride2)-->  n_ctx=8, n_state=32, 4 heads, 2 layers
    B, N_MELS, N_FRAMES = 2, 8, 16
    N_STATE, N_HEAD, N_LAYER = 32, 4, 2
    N_CTX = N_FRAMES // 2

    key = jax.random.PRNGKey(0)
    k_params, k_x = jax.random.split(key)
    params = init_params(
        k_params, n_mels=N_MELS, n_state=N_STATE, n_head=N_HEAD,
        n_layer=N_LAYER, n_ctx=N_CTX, dtype=jnp.bfloat16,
    )
    x = jax.random.normal(k_x, (B, N_MELS, N_FRAMES), dtype=jnp.float32).astype(jnp.bfloat16)

    out = audio_encoder_forward(x, params)
    out = jax.block_until_ready(out)
    assert out.shape == (B, N_CTX, N_STATE), out.shape
    print("KERNEL_OK")
</pallas_src>

<mosaic_0001>
module attributes {stable_mosaic.version = 11 : i64} {
  func.func @kernel(%arg0: i32, %arg1: i32, %arg2: i32, %arg3: memref<32x24xbf16, #tpu.memory_space<vmem>>, %arg4: memref<24x32xbf16, #tpu.memory_space<vmem>>, %arg5: memref<1x32xbf16, #tpu.memory_space<vmem>>, %arg6: memref<32x32xbf16, #tpu.memory_space<vmem>>, %arg7: memref<32x32xf32, #tpu.memory_space<vmem>>) attributes {dimension_semantics = [#tpu.dimension_semantics<parallel>, #tpu.dimension_semantics<parallel>, #tpu.dimension_semantics<arbitrary>], iteration_bounds = array<i64: 1, 1, 1>, scalar_prefetch = 0 : i64, scratch_operands = 1 : i64, tpu.core_type = #tpu.core_type<tc>, window_params = [{transform_indices = @transform_0, window_bounds = array<i64: 32, 24>}, {transform_indices = @transform_1, window_bounds = array<i64: 24, 32>}, {transform_indices = @transform_2, window_bounds = array<i64: 1, 32>}, {transform_indices = @transform_3, window_bounds = array<i64: 32, 32>}]} {
    %c0_i32 = arith.constant 0 : i32
    %0 = arith.cmpi eq, %arg2, %c0_i32 : i32
    %1 = arith.extui %0 : i1 to i32
    %c0_i32_0 = arith.constant 0 : i32
    %2 = arith.cmpi ne, %1, %c0_i32_0 : i32
    scf.if %2 {
      %cst_10 = arith.constant 0.000000e+00 : f32
      %12 = vector.broadcast %cst_10 : f32 to vector<32x32xf32>
      %c0_11 = arith.constant 0 : index
      %c0_12 = arith.constant 0 : index
      %13 = vector.load %arg7[%c0_11, %c0_12] : memref<32x32xf32, #tpu.memory_space<vmem>>, vector<32x32xf32>
      tpu.vector_store %arg7[%c0_11, %c0_12], %12 {strides = array<i32>} : memref<32x32xf32, #tpu.memory_space<vmem>>, vector<32x32xf32>,
    } else {
    }
    %c0 = arith.constant 0 : index
    %c0_1 = arith.constant 0 : index
    %3 = vector.load %arg7[%c0, %c0_1] : memref<32x32xf32, #tpu.memory_space<vmem>>, vector<32x32xf32>
    %c0_2 = arith.constant 0 : index
    %c0_3 = arith.constant 0 : index
    %4 = vector.load %arg3[%c0_2, %c0_3] : memref<32x24xbf16, #tpu.memory_space<vmem>>, vector<32x24xbf16>
    %c0_4 = arith.constant 0 : index
    %c0_5 = arith.constant 0 : index
    %5 = vector.load %arg4[%c0_4, %c0_5] : memref<24x32xbf16, #tpu.memory_space<vmem>>, vector<24x32xbf16>
    %cst = arith.constant dense<0.000000e+00> : vector<32x32xf32>
    %6 = tpu.matmul %4, %5, %cst {dimension_numbers = #tpu.dot_dimension_numbers<[1], [0], [0], [1], [0, 0, 1, 1], [], []>} : vector<32x24xbf16>, vector<24x32xbf16>, vector<32x32xf32> -> vector<32x32xf32>
    %7 = arith.addf %3, %6 : vector<32x32xf32>
    %c0_6 = arith.constant 0 : index
    %c0_7 = arith.constant 0 : index
    %8 = vector.load %arg7[%c0_6, %c0_7] : memref<32x32xf32, #tpu.memory_space<vmem>>, vector<32x32xf32>
    tpu.vector_store %arg7[%c0_6, %c0_7], %7 {strides = array<i32>} : memref<32x32xf32, #tpu.memory_space<vmem>>, vector<32x32xf32>,
    %c0_i32_8 = arith.constant 0 : i32
    %9 = arith.cmpi eq, %arg2, %c0_i32_8 : i32
    %10 = arith.extui %9 : i1 to i32
    %c0_i32_9 = arith.constant 0 : i32
    %11 = arith.cmpi ne, %10, %c0_i32_9 : i32
    scf.if %11 {
      %c0_10 = arith.constant 0 : index
      %c0_11 = arith.constant 0 : index
      %12 = vector.load %arg7[%c0_10, %c0_11] : memref<32x32xf32, #tpu.memory_space<vmem>>, vector<32x32xf32>
      %c0_12 = arith.constant 0 : index
      %c0_13 = arith.constant 0 : index
      %13 = vector.load %arg5[%c0_12, %c0_13] : memref<1x32xbf16, #tpu.memory_space<vmem>>, vector<1x32xbf16>
      %14 = arith.extf %13 : vector<1x32xbf16> to vector<1x32xf32>
      %15 = vector.broadcast %14 : vector<1x32xf32> to vector<32x32xf32>
      %16 = arith.addf %12, %15 : vector<32x32xf32>
      %cst_14 = arith.constant 5.000000e-01 : f32
      %17 = vector.broadcast %cst_14 : f32 to vector<32x32xf32>
      %18 = arith.mulf %17, %16 : vector<32x32xf32>
      %cst_15 = arith.constant 4.471500e-02 : f32
      %19 = vector.broadcast %cst_15 : f32 to vector<32x32xf32>
      %20 = arith.mulf %19, %16 : vector<32x32xf32>
      %21 = arith.mulf %20, %16 : vector<32x32xf32>
      %22 = arith.mulf %21, %16 : vector<32x32xf32>
      %23 = arith.addf %16, %22 : vector<32x32xf32>
      %cst_16 = arith.constant 0.797884583 : f32
      %24 = vector.broadcast %cst_16 : f32 to vector<32x32xf32>
      %25 = arith.mulf %24, %23 : vector<32x32xf32>
      %26 = math.tanh %25 : vector<32x32xf32>
      %cst_17 = arith.constant 1.000000e+00 : f32
      %27 = vector.broadcast %cst_17 : f32 to vector<32x32xf32>
      %28 = arith.addf %27, %26 : vector<32x32xf32>
      %29 = arith.mulf %18, %28 : vector<32x32xf32>
      %30 = arith.truncf %29 : vector<32x32xf32> to vector<32x32xbf16>
      %c0_18 = arith.constant 0 : index
      %c0_19 = arith.constant 0 : index
      %31 = vector.load %arg6[%c0_18, %c0_19] : memref<32x32xbf16, #tpu.memory_space<vmem>>, vector<32x32xbf16>
      tpu.vector_store %arg6[%c0_18, %c0_19], %30 {strides = array<i32>} : memref<32x32xbf16, #tpu.memory_space<vmem>>, vector<32x32xbf16>,
    } else {
    }
    return
  }
  func.func @transform_0(%arg0: i32, %arg1: i32, %arg2: i32) -> (i32, i32) {
    %c0_i32 = arith.constant 0 : i32
    return %arg0, %arg2 : i32, i32
  }
  func.func @transform_1(%arg0: i32, %arg1: i32, %arg2: i32) -> (i32, i32) {
    %c0_i32 = arith.constant 0 : i32
    return %arg2, %arg1 : i32, i32
  }
  func.func @transform_2(%arg0: i32, %arg1: i32, %arg2: i32) -> (i32, i32) {
    %c0_i32 = arith.constant 0 : i32
    %c0_i32_0 = arith.constant 0 : i32
    return %c0_i32, %arg1 : i32, i32
  }
  func.func @transform_3(%arg0: i32, %arg1: i32, %arg2: i32) -> (i32, i32) {
    %c0_i32 = arith.constant 0 : i32
    return %arg0, %arg1 : i32, i32
  }
}

</mosaic_0001>

<bundles_post_ra>
// kernel: tpu_custom_call.1
= control target key start
LH: loop header
LB: loop body
LE: loop exit
PB: predicated region body
PF: predicated region fallthrough
CT: control target
= control target key end

     0   :  { %vm62_vm0 = vcmask 1043456   ;;  %vm55_vm1 = vcmask 195584   ;;  %vm20_vm2 = vcmask 261120   ;;  %v279_v4 = vmov 0.0   ;;  %s333_s0 = inlined_call_operand.vmem [shape: bf16[32,24], index: 0, kind: input, shape index: {}]   ;;  %s334_s1 = inlined_call_operand.vmem [shape: bf16[24,32], index: 1, kind: input, shape index: {}]   ;;  %s335_s2 = inlined_call_operand.vmem [shape: bf16[1,32], index: 2, kind: input, shape index: {}]   ;;  %s336_s3 = inlined_call_operand.hbm [shape: bf16[32,32], index: 3, kind: output, shape index: {}]  }
   0x1   :  { %v245_v0 = vld [vmem:[%s334_s1 + $0x8] ss:$0 sps:$4 sm:$0xff]   ;;  %v246_v1 = vld [vmem:[%s334_s1] sm:$0xff]   ;;  %23 = vst.msk [vmem:[#allocation2 + $0x10] sm:$0xff] %vm20_vm2, %v279_v4  ;;  %21 = vst.msk [vmem:[#allocation2] sm:$0xff] %vm20_vm2, %v279_v4 }
   0x2   :  { %240 = vmatprep.subr.msk.bf16.mxu0 %vm62_vm0, %v245_v0  ;;  %v64_v2 = vsel %vm62_vm0, %v245_v0, 0  ;;  %v247_v3 = vld [vmem:[%s333_s0] sm:$0xff]   ;;  %22 = vst.msk [vmem:[#allocation2 + $0x8] sm:$0xff] %vm20_vm2, %v279_v4  ;;  %24 = vst.msk [vmem:[#allocation2 + $0x18] sm:$0xff] %vm20_vm2, %v279_v4 }
   0x3   :  { %233 = vmatpush3.bf16.msra.mxu0 %v64_v2  ;;  %236 = vmatprep.mubr.msk.bf16.mxu0 %vm55_vm1, %v247_v3 }
   0x4   :  { %234 = vmatprep.subr.bf16.mxu0 %v246_v1 }
   0x5   :  { %8 = vsyncpa [#allocation4], 0  ;;  %v248_v5 = vld [vmem:[%s333_s0 + $0x8] sm:$0xff]   ;;  %v133_v6 = vlaneseq  ;;  %v131_v11 = vld [vmem:[%s335_s2] sm:$0x1]  ;;  %vm193_vm3 = vcmask 257024  }
   0x6   :  { %v132_v16 = vunpack.c.l.bf16 %v131_v11  ;;  %s280_s0 = smov [#allocation3]  }
   0x7   :  { %235 = vmatpush3.bf16.msra.mxu0 %v246_v1  ;;  %v134_v8 = vshrl.u32 %v133_v6, 7  ;;  %s203_s2 = sshll.u32 %s280_s0, 4  ;;  %s204_s2 = int_to_ptr.vmem [resolvable:$true] %s203_s2 }
   0x8   :  { %v27_v7 = vld [vmem:[#allocation2 + $0x10] sm:$0xff]  ;;  %v25_v10 = vld [vmem:[#allocation2] sm:$0xff]  ;;  %s257_s21 = scalar_lea.vmem %s204_s2, 256  ;;  %p262_p1 = scmp.lt.s32.totalorder %s204_s2, %s204_s2 }
   0x9   :  { %v28_v14 = vld [vmem:[#allocation2 + $0x18] sm:$0xff]  ;;  %v135_v17 = vsub.s32 0, %v134_v8  ;;  %v26_v19 = vld [vmem:[#allocation2 + $0x8] sm:$0xff]  ;;  %p258_p0 = scmp.ne.s32.totalorder %s204_s2, %s257_s21  ;;  %p263_p2 = scmp.lt.s32.totalorder %s257_s21, %s257_s21 }
   0xa   :  { %237 = vmatmul.mubr.msk.bf16.vlgmr.msra.gmra.mxu0 %vm55_vm1, %v248_v5 }
   0xb   :  { %v136_v23 = vrot.slane %v132_v16, %v135_v17  ;;  %p264_p3 = por %p263_p2, %p262_p1 }
   0xd   :  { %p265_p4 = pnand %p264_p3, %p258_p0 }
  0xca   :  { %v238_v9 = vpop.f32.mrf.mxu0 }
  0xcb   :  { %v117_v12 = vadd.f32 %v238_v9, %v27_v7 }
  0xcc   :  { %v100_v13 = vpop.f32.mrf.mxu0 }
  0xcd   :  { %122 = vst.msk [vmem:[#allocation2 + $0x10] sm:$0xff] %vm20_vm2, %v117_v12  ;;  %v115_v15 = vadd.f32 %v100_v13, %v25_v10 }
  0xce   :  { %v239_v18 = vpop.f32.mrf.mxu0 }
  0xcf   :  { %120 = vst.msk [vmem:[#allocation2] sm:$0xff] %vm20_vm2, %v115_v15  ;;  %v118_v20 = vadd.f32 %v239_v18, %v28_v14 }
  0xd0   :  { %v103_v21 = vpop.f32.mrf.mxu0 }
  0xd1   :  { %123 = vst.msk [vmem:[#allocation2 + $0x18] sm:$0xff] %vm20_vm2, %v118_v20  ;;  %v116_v22 = vadd.f32 %v103_v21, %v26_v19 }
  0xd3   :  { %121 = vst.msk [vmem:[#allocation2 + $0x8] sm:$0xff] %vm20_vm2, %v116_v22 }
  0xd4   :  { %v129_v24 = vld [vmem:[#allocation2 + $0x10] sm:$0xff] }
  0xd5   :  { %v139_v25 = vadd.f32 %v136_v23, %v129_v24 }
  0xd6   :  { %v127_v26 = vld [vmem:[#allocation2] sm:$0xff] }
  0xd7   :  { %v137_v27 = vadd.f32 %v136_v23, %v127_v26  ;;  %v147_v28 = vmul.f32 0.044715, %v139_v25  ;;  %v143_v54 = vmul.f32 0.5, %v139_v25 }
  0xd8   :  { %v130_v29 = vld [vmem:[#allocation2 + $0x18] sm:$0xff] }
  0xd9   :  { %v140_v30 = vadd.f32 %v136_v23, %v130_v29  ;;  %v145_v31 = vmul.f32 0.044715, %v137_v27  ;;  %v151_v32 = vmul.f32 %v147_v28, %v139_v25  ;;  %v141_v56 = vmul.f32 0.5, %v137_v27 }
  0xda   :  { %v128_v33 = vld [vmem:[#allocation2 + $0x8] sm:$0xff] }
  0xdb   :  { %v138_v34 = vadd.f32 %v136_v23, %v128_v33  ;;  %v148_v35 = vmul.f32 0.044715, %v140_v30  ;;  %v149_v36 = vmul.f32 %v145_v31, %v137_v27  ;;  %v155_v37 = vmul.f32 %v151_v32, %v139_v25 }
  0xdc   :  { %v144_v60 = vmul.f32 0.5, %v140_v30 }
  0xdd   :  { %v146_v38 = vmul.f32 0.044715, %v138_v34  ;;  %v152_v39 = vmul.f32 %v148_v35, %v140_v30  ;;  %v153_v40 = vmul.f32 %v149_v36, %v137_v27  ;;  %v159_v41 = vadd.f32 %v155_v37, %v139_v25 }
  0xde   :  { %v142_v1 = vmul.f32 0.5, %v138_v34 }
  0xdf   :  { %v150_v42 = vmul.f32 %v146_v38, %v138_v34  ;;  %v156_v43 = vmul.f32 %v152_v39, %v140_v30  ;;  %v157_v44 = vadd.f32 %v153_v40, %v137_v27  ;;  %v163_v45 = vmul.f32 0.7978846, %v159_v41 }
  0xe1   :  { %v154_v46 = vmul.f32 %v150_v42, %v138_v34  ;;  %v160_v47 = vadd.f32 %v156_v43, %v140_v30  ;;  %v161_v48 = vmul.f32 0.7978846, %v157_v44  ;;  %249 = vtanh.f32 %v163_v45 }
  0xe3   :  { %v158_v49 = vadd.f32 %v154_v46, %v138_v34  ;;  %v164_v50 = vmul.f32 0.7978846, %v160_v47  ;;  %251 = vtanh.f32 %v161_v48 }
  0xe5   :  { %v162_v51 = vmul.f32 0.7978846, %v158_v49  ;;  %253 = vtanh.f32 %v164_v50 }
  0xe7   :  { %255 = vtanh.f32 %v162_v51 }
  0xee   :  { %v250_v52 = vpop.eup %249 }
  0xef   :  { %v171_v55 = vadd.f32 1.0, %v250_v52 }
  0xf0   :  { %v252_v53 = vpop.eup %251 }
  0xf1   :  { %v169_v57 = vadd.f32 1.0, %v252_v53  ;;  %v175_v59 = vmul.f32 %v171_v55, %v143_v54 }
  0xf2   :  { %v254_v58 = vpop.eup %253 }
  0xf3   :  { %v172_v61 = vadd.f32 1.0, %v254_v58  ;;  %v173_v62 = vmul.f32 %v169_v57, %v141_v56  ;;  %v226_v0 = vpack.c.bf16 %v175_v59, %v175_v59 }
  0xf4   :  { %v256_v63 = vpop.eup %255 }
  0xf5   :  { %v170_v2 = vadd.f32 1.0, %v256_v63  ;;  %v176_v3 = vmul.f32 %v172_v61, %v144_v60  ;;  %v224_v4 = vpack.c.bf16 %v173_v62, %v173_v62  ;;  %196 = vst.msk [vmem:[#allocation3 + $0x8] sm:$0xf] %vm193_vm3, %v226_v0 }
  0xf7   :  { %v174_v5 = vmul.f32 %v170_v2, %v142_v1  ;;  %v227_v6 = vpack.c.bf16 %v176_v3, %v176_v3  ;;  %194 = vst.msk [vmem:[#allocation3] sm:$0xf] %vm193_vm3, %v224_v4 }
  0xf9   :  { %v225_v7 = vpack.c.bf16 %v174_v5, %v174_v5  ;;  %197 = vst.msk [vmem:[#allocation3 + $0xc] sm:$0xf] %vm193_vm3, %v227_v6 }
  0xfb   :  { %195 = vst.msk [vmem:[#allocation3 + $0x4] sm:$0xf] %vm193_vm3, %v225_v7 }
  0xfc   :  { %268 = shalt.err (!%p265_p4)
}
  0xfd   :  { %s281_s22 = smov 64   ;;  %s282_s23 = smov 4  }
  0xfe   :  { %209 = dma.vmem_to_hbm [thread:$0]  %s204_s2, 256, %s336_s3, [#allocation4], %s281_s22, %s281_s22, %s282_s23  }
  0xff   :  { %277 = dma.done.wait [#allocation4], 256  }
 0x100   :  { %278 = vsyncadd [#allocation4], 4294967040 }
 0x101   :  { %213 = vsyncpa [#allocation4], 1 }

</bundles_post_ra>
